<compile_context>
chip_gen: v6e
topology: v6e:2x2x1
jax: 0.10.0
libtpu: 0.0.40
codegen_flags: <defaults>
</compile_context>

<pallas_src>
import functools
import math

import jax
import jax.numpy as jnp
from jax.experimental import pallas as pl
from jax.experimental.pallas import tpu as pltpu


# ----------------------------------------------------------------------------- kernel ---
def _make_kernel(B, C, v_tile, s_blk, n_valid, needs_mask):
    """Kernel for grid point (so, v): s_blk antithetic eps pairs, one voxel tile."""

    def kernel(mean_ref, sigma_ref, eps_ref, tgt_ref, out_ref, acc_ref):
        v = pl.program_id(1)
        is_first = v == 0
        is_not_first = v > 0
        is_last = v == pl.num_programs(1) - 1

        # Shared streams loaded once per grid step; all arithmetic in f32.
        mean = mean_ref[...].astype(jnp.float32)                        # (B, C, vt)
        sigma = sigma_ref[...].astype(jnp.float32)                      # (B, C, vt)
        tgt = tgt_ref[...][:, None, :]                                  # (B, 1, vt) int32

        cls = jax.lax.broadcasted_iota(jnp.int32, (B, C, v_tile), 1)    # (B, C, vt)
        onehot = cls == tgt                                             # (B, C, vt)
        # One-hot gather of the mean logit is shared by both antithetic signs.
        t_mean = jnp.sum(jnp.where(onehot, mean, 0.0), axis=1)          # (B, vt)

        if needs_mask:
            lane = jax.lax.broadcasted_iota(jnp.int32, (1, v_tile), 1)
            valid = (v * v_tile + lane) < n_valid                       # (1, vt)

        def _lse(lg):
            # numerically-stable logsumexp over the class (second-minor) axis
            m = jnp.max(lg, axis=1, keepdims=True)                      # (B, 1, vt)
            return (m + jnp.log(jnp.sum(jnp.exp(lg - m), axis=1, keepdims=True)))[:, 0, :]

        for s in range(s_blk):
            sig_eps = sigma * eps_ref[s].astype(jnp.float32)            # (B, C, vt)
            t_se = jnp.sum(jnp.where(onehot, sig_eps, 0.0), axis=1)     # (B, vt)
            lp_pos = (t_mean + t_se) - _lse(mean + sig_eps)             # sample so*s_blk+s
            lp_neg = (t_mean - t_se) - _lse(mean - sig_eps)             # antithetic twin
            if needs_mask:
                lp_pos = jnp.where(valid, lp_pos, 0.0)
                lp_neg = jnp.where(valid, lp_neg, 0.0)

            @pl.when(is_first)
            def _(lp_pos=lp_pos, lp_neg=lp_neg, s=s):                   # overwrite: no zero-fill
                acc_ref[s, 0, :, :] = lp_pos
                acc_ref[s, 1, :, :] = lp_neg

            @pl.when(is_not_first)
            def _(lp_pos=lp_pos, lp_neg=lp_neg, s=s):
                acc_ref[s, 0, :, :] += lp_pos
                acc_ref[s, 1, :, :] += lp_neg

        @pl.when(is_last)
        def _finalize():
            # Fold the per-lane accumulator down to 128 lanes (pure VALU, static 128-wide
            # slices); the final 128-lane sum is done by the wrapper on a tiny array.
            for s in range(s_blk):
                for sign in range(2):
                    r = acc_ref[s, sign, :, 0:128]
                    for i in range(1, v_tile // 128):
                        r = r + acc_ref[s, sign, :, i * 128:(i + 1) * 128]
                    out_ref[s, sign, :, :] = r

    return kernel


# ------------------------------------------------------------------- tiling / VMEM plan ---
def _vmem_info():
    try:
        cap = int(pltpu.get_tpu_info().vmem_capacity_bytes)
    except Exception:
        cap = 64 * 1024 * 1024          # conservative fallback: v7x-sized VMEM (64 MiB/TC)
    return cap, cap <= 64 * 1024 * 1024


def _pad_to(n, m):
    return ((n + m - 1) // m) * m


def _sublane_multiple(dtype):
    # VMEM tiles pad the second-minor dim to 32 bytes of rows: f32/i32 -> 8, bf16 -> 16.
    return max(8, 32 // jnp.dtype(dtype).itemsize)


def _block_vmem_bytes(B, C, v_tile, s_blk, ms_dtype, eps_dtype):
    ms_i = jnp.dtype(ms_dtype).itemsize
    ep_i = jnp.dtype(eps_dtype).itemsize
    c_ms = _pad_to(C, _sublane_multiple(ms_dtype))
    c_ep = _pad_to(C, _sublane_multiple(eps_dtype))
    b_pad = _pad_to(B, 8)
    mean_b = B * c_ms * v_tile * ms_i
    sigma_b = mean_b
    eps_b = s_blk * B * c_ep * v_tile * ep_i
    tgt_b = b_pad * v_tile * 4
    out_b = s_blk * 2 * b_pad * 128 * 4
    acc_b = s_blk * 2 * b_pad * v_tile * 4
    # inputs / outputs are double-buffered by the pipeline; the accumulator is not.
    return 2 * (mean_b + sigma_b + eps_b + tgt_b) + 2 * out_b + acc_b


def _select_tiling(B, C, V, s_half, ms_dtype, eps_dtype, v_tile_cap=None):
    vmem_cap, small_vmem = _vmem_info()
    limit_cap = int(0.75 * vmem_cap)                 # <=48 MiB on v7x, <=96 MiB on v5e/v6e
    if v_tile_cap is None:
        v_tile_cap = 1024 if small_vmem else 2048
    v_tile_cap = max(128, (int(v_tile_cap) // 128) * 128)
    v_full = _pad_to(V, 128)

    vt_candidates = sorted({min(v_tile_cap, v_full)} |
                           {t for t in (2048, 1024, 512, 256, 128)
                            if t <= min(v_tile_cap, v_full)},
                           reverse=True)
    s_candidates = [d for d in range(s_half, 0, -1) if s_half % d == 0]
    if small_vmem and s_half >= 2:
        # keep >=2 steps on the "parallel" sample axis so megacore (v7x, 2 TCs) can split it
        s_candidates = [d for d in s_candidates if s_half // d >= 2] or [1]

    for vt in vt_candidates:
        for sb in s_candidates:
            need = _block_vmem_bytes(B, C, vt, sb, ms_dtype, eps_dtype)
            if need <= limit_cap:
                vmem_limit = int(min(limit_cap, max(need + (4 << 20), 32 << 20)))
                return vt, sb, vmem_limit
    # Budget model says nothing fits: fall back to the smallest tiles, let Mosaic decide.
    return 128, 1, limit_cap


# ---------------------------------------------------------------------------- wrappers ---
def ssn_voxel_logprob_sums(mean_cv, sigma_cv, eps_cv, target_v, *, v_tile_cap=None):
    """Per-MC-sample voxel sums of log p(target | mean ± sigma*eps).

    mean_cv, sigma_cv : (B, C, V)        float (bf16 recommended)
    eps_cv            : (S//2, B, C, V)  float (bf16 recommended; dominant HBM stream)
    target_v          : (B, V) integer labels in [0, C)
    returns           : (S, B) float32; rows [0:S//2] use +eps, rows [S//2:] use -eps.
    """
    s_half, B, C, V = eps_cv.shape
    assert mean_cv.shape == (B, C, V) and sigma_cv.shape == (B, C, V)
    assert target_v.shape == (B, V)

    tgt = target_v.astype(jnp.int32)                               # (B, V)
    v_tile, s_blk, vmem_limit = _select_tiling(B, C, V, s_half,
                                               mean_cv.dtype, eps_cv.dtype, v_tile_cap)
    num_v = pl.cdiv(V, v_tile)
    s_outer = s_half // s_blk
    needs_mask = (V % v_tile) != 0          # last tile overhangs; mask garbage lanes

    kernel = _make_kernel(B, C, v_tile, s_blk, V, needs_mask)
    out = pl.pallas_call(
        kernel,
        out_shape=jax.ShapeDtypeStruct((s_half, 2, B, 128), jnp.float32),
        grid_spec=pltpu.PrefetchScalarGridSpec(
            num_scalar_prefetch=0,
            grid=(s_outer, num_v),
            in_specs=[
                pl.BlockSpec((B, C, v_tile), lambda so, v: (0, 0, v)),             # mean
                pl.BlockSpec((B, C, v_tile), lambda so, v: (0, 0, v)),             # sigma
                pl.BlockSpec((s_blk, B, C, v_tile), lambda so, v: (so, 0, 0, v)),  # eps
                pl.BlockSpec((B, v_tile), lambda so, v: (0, v)),                   # target
            ],
            out_specs=pl.BlockSpec((s_blk, 2, B, 128), lambda so, v: (so, 0, 0, 0)),
            scratch_shapes=[pltpu.VMEM((s_blk, 2, B, v_tile), jnp.float32)],
        ),
        compiler_params=pltpu.CompilerParams(
            dimension_semantics=("parallel", "arbitrary"),
            vmem_limit_bytes=vmem_limit),
    )(mean_cv, sigma_cv, eps_cv, tgt)

    per = jnp.sum(out, axis=-1)                                   # (S//2, 2, B), tiny
    return jnp.concatenate([per[:, 0], per[:, 1]], axis=0)        # (S, B), torch.cat order


def ssn_loss_mc_integral(logit_mean, sigma, eps, target, num_mc_samples,
                         *, v_tile_cap=None, io_dtype=jnp.bfloat16):
    """Forward pass of StochasticSegmentationNetworkLossMCIntegral.

    Randomness is externalized: eps ~ N(0,1) of shape (S//2, B, C, H, W) plays the role of
    the diagonal Normal's rsample noise; the antithetic pair [mean + sigma*eps,
    mean - sigma*eps] is formed inside the Pallas kernel (never materialized in HBM).
    Generate eps directly in bfloat16 for best HBM efficiency — the wrapper does NOT cast
    it (that would be an extra full HBM pass over the largest tensor).
    """
    S = num_mc_samples
    assert S % 2 == 0
    B, C, H, W = logit_mean.shape
    assert C >= 2
    assert eps.shape == (S // 2, B, C, H, W)
    V = H * W

    mean_cv = logit_mean.reshape(B, C, V).astype(io_dtype)        # small casts
    sigma_cv = sigma.reshape(B, C, V).astype(io_dtype)
    eps_cv = eps.reshape(S // 2, B, C, V)                         # no cast of the big stream
    tgt_v = target.reshape(B, V)

    per_sb = ssn_voxel_logprob_sums(mean_cv, sigma_cv, eps_cv, tgt_v,
                                    v_tile_cap=v_tile_cap)        # (S, B)
    loglikelihood = jnp.mean(jax.nn.logsumexp(per_sb, axis=0) - math.log(S))
    return -loglikelihood / V


# -------------------------------------------------------------------------------- main ---
if __name__ == "__main__":
    key = jax.random.PRNGKey(0)
    S, B, C, H, W = 4, 2, 4, 16, 16          # num_mc_samples must be even
    V = H * W

    k1, k2, k3, k4 = jax.random.split(key, 4)
    logit_mean = jax.random.normal(k1, (B, C, H, W), dtype=jnp.float32)
    sigma = 0.5 * jnp.abs(jax.random.normal(k2, (B, C, H, W), dtype=jnp.float32)) + 0.1
    target = jax.random.randint(k3, (B, H, W), 0, C, dtype=jnp.int32)
    # Gaussian noise for the antithetic samples, generated directly in bf16 so the
    # dominant HBM stream is never cast or padded afterwards.
    eps = jax.random.normal(k4, (S // 2, B, C, H, W), dtype=jnp.bfloat16)

    loss_fn = jax.jit(functools.partial(ssn_loss_mc_integral, num_mc_samples=S))
    loss = loss_fn(logit_mean, sigma, eps, target)
    jax.block_until_ready(loss)

    # ---- pure-JAX reference (same bf16-rounded inputs, f32 math) ----
    mean_f = logit_mean.astype(jnp.bfloat16).astype(jnp.float32).reshape(B, C, V)
    sigma_f = sigma.astype(jnp.bfloat16).astype(jnp.float32).reshape(B, C, V)
    eps_f = eps.astype(jnp.float32).reshape(S // 2, B, C, V)
    se = sigma_f[None] * eps_f
    logit_sample = jnp.concatenate([mean_f[None] + se, mean_f[None] - se], axis=0)  # (S,B,C,V)
    logp = jax.nn.log_softmax(logit_sample, axis=2)
    tgt_idx = jnp.broadcast_to(target.reshape(1, B, 1, V), (S, B, 1, V))
    lp = jnp.take_along_axis(logp, tgt_idx, axis=2)[:, :, 0, :]
    per_ref = jnp.sum(lp, axis=-1)                                                  # (S, B)
    ref_loss = -(jnp.mean(jax.nn.logsumexp(per_ref, axis=0) - math.log(S))) / V

    assert jnp.allclose(loss, ref_loss, atol=2e-4, rtol=2e-4), (loss, ref_loss)
    print("KERNEL_OK")
</pallas_src>

<mosaic_0001>
module attributes {stable_mosaic.version = 11 : i64} {
  func.func @kernel(%arg0: i32, %arg1: i32, %arg2: memref<2x4x256xbf16, #tpu.memory_space<vmem>>, %arg3: memref<2x4x256xbf16, #tpu.memory_space<vmem>>, %arg4: memref<1x2x4x256xbf16, #tpu.memory_space<vmem>>, %arg5: memref<2x256xi32, #tpu.memory_space<vmem>>, %arg6: memref<1x2x2x128xf32, #tpu.memory_space<vmem>>, %arg7: memref<1x2x2x256xf32, #tpu.memory_space<vmem>>) attributes {dimension_semantics = [#tpu.dimension_semantics<parallel>, #tpu.dimension_semantics<arbitrary>], iteration_bounds = array<i64: 2, 1>, scalar_prefetch = 0 : i64, scratch_operands = 1 : i64, tpu.core_type = #tpu.core_type<tc>, window_params = [{transform_indices = @transform_0, window_bounds = array<i64: 2, 4, 256>}, {transform_indices = @transform_1, window_bounds = array<i64: 2, 4, 256>}, {transform_indices = @transform_2, window_bounds = array<i64: 1, 2, 4, 256>}, {transform_indices = @transform_3, window_bounds = array<i64: 2, 256>}, {transform_indices = @transform_4, window_bounds = array<i64: 1, 2, 2, 128>}]} {
    %c0_i32 = arith.constant 0 : i32
    %0 = arith.cmpi eq, %arg1, %c0_i32 : i32
    %c0_i32_0 = arith.constant 0 : i32
    %1 = arith.cmpi sgt, %arg1, %c0_i32_0 : i32
    %c0_i32_1 = arith.constant 0 : i32
    %2 = arith.cmpi eq, %arg1, %c0_i32_1 : i32
    %c0 = arith.constant 0 : index
    %c0_2 = arith.constant 0 : index
    %c0_3 = arith.constant 0 : index
    %3 = vector.load %arg2[%c0, %c0_2, %c0_3] : memref<2x4x256xbf16, #tpu.memory_space<vmem>>, vector<2x4x256xbf16>
    %4 = arith.extf %3 : vector<2x4x256xbf16> to vector<2x4x256xf32>
    %c0_4 = arith.constant 0 : index
    %c0_5 = arith.constant 0 : index
    %c0_6 = arith.constant 0 : index
    %5 = vector.load %arg3[%c0_4, %c0_5, %c0_6] : memref<2x4x256xbf16, #tpu.memory_space<vmem>>, vector<2x4x256xbf16>
    %6 = arith.extf %5 : vector<2x4x256xbf16> to vector<2x4x256xf32>
    %c0_7 = arith.constant 0 : index
    %c0_8 = arith.constant 0 : index
    %7 = vector.load %arg5[%c0_7, %c0_8] : memref<2x256xi32, #tpu.memory_space<vmem>>, vector<2x256xi32>
    %8 = vector.shape_cast %7 : vector<2x256xi32> to vector<2x1x256xi32>
    %9 = tpu.iota {dimensions = array<i32: 1>} : vector<2x4x256xi32>
    %10 = vector.broadcast %8 : vector<2x1x256xi32> to vector<2x4x256xi32>
    %11 = arith.cmpi eq, %9, %10 : vector<2x4x256xi32>
    %cst = arith.constant 0.000000e+00 : f32
    %12 = vector.broadcast %cst : f32 to vector<2x4x256xf32>
    %13 = arith.select %11, %4, %12 : vector<2x4x256xi1>, vector<2x4x256xf32>
    %cst_9 = arith.constant dense<0.000000e+00> : vector<2x256xf32>
    %14 = vector.multi_reduction <add>, %13, %cst_9 [1] : vector<2x4x256xf32> to vector<2x256xf32>
    %c0_10 = arith.constant 0 : index
    %c0_11 = arith.constant 0 : index
    %c0_12 = arith.constant 0 : index
    %c0_13 = arith.constant 0 : index
    %15 = vector.load %arg4[%c0_10, %c0_11, %c0_12, %c0_13] : memref<1x2x4x256xbf16, #tpu.memory_space<vmem>>, vector<1x2x4x256xbf16>
    %16 = vector.shape_cast %15 : vector<1x2x4x256xbf16> to vector<2x4x256xbf16>
    %17 = arith.extf %16 : vector<2x4x256xbf16> to vector<2x4x256xf32>
    %18 = arith.mulf %6, %17 : vector<2x4x256xf32>
    %cst_14 = arith.constant 0.000000e+00 : f32
    %19 = vector.broadcast %cst_14 : f32 to vector<2x4x256xf32>
    %20 = arith.select %11, %18, %19 : vector<2x4x256xi1>, vector<2x4x256xf32>
    %cst_15 = arith.constant dense<0.000000e+00> : vector<2x256xf32>
    %21 = vector.multi_reduction <add>, %20, %cst_15 [1] : vector<2x4x256xf32> to vector<2x256xf32>
    %22 = arith.addf %14, %21 : vector<2x256xf32>
    %23 = arith.addf %4, %18 : vector<2x4x256xf32>
    %cst_16 = arith.constant dense<0xFF800000> : vector<2x256xf32>
    %24 = vector.multi_reduction <maximumf>, %23, %cst_16 [1] : vector<2x4x256xf32> to vector<2x256xf32>
    %25 = vector.shape_cast %24 : vector<2x256xf32> to vector<2x1x256xf32>
    %26 = vector.broadcast %25 : vector<2x1x256xf32> to vector<2x4x256xf32>
    %27 = arith.subf %23, %26 : vector<2x4x256xf32>
    %28 = math.exp %27 : vector<2x4x256xf32>
    %cst_17 = arith.constant dense<0.000000e+00> : vector<2x256xf32>
    %29 = vector.multi_reduction <add>, %28, %cst_17 [1] : vector<2x4x256xf32> to vector<2x256xf32>
    %30 = vector.shape_cast %29 : vector<2x256xf32> to vector<2x1x256xf32>
    %31 = math.log %30 : vector<2x1x256xf32>
    %32 = arith.addf %25, %31 : vector<2x1x256xf32>
    %33 = vector.shape_cast %32 : vector<2x1x256xf32> to vector<2x256xf32>
    %34 = arith.subf %22, %33 : vector<2x256xf32>
    %35 = arith.subf %14, %21 : vector<2x256xf32>
    %36 = arith.subf %4, %18 : vector<2x4x256xf32>
    %cst_18 = arith.constant dense<0xFF800000> : vector<2x256xf32>
    %37 = vector.multi_reduction <maximumf>, %36, %cst_18 [1] : vector<2x4x256xf32> to vector<2x256xf32>
    %38 = vector.shape_cast %37 : vector<2x256xf32> to vector<2x1x256xf32>
    %39 = vector.broadcast %38 : vector<2x1x256xf32> to vector<2x4x256xf32>
    %40 = arith.subf %36, %39 : vector<2x4x256xf32>
    %41 = math.exp %40 : vector<2x4x256xf32>
    %cst_19 = arith.constant dense<0.000000e+00> : vector<2x256xf32>
    %42 = vector.multi_reduction <add>, %41, %cst_19 [1] : vector<2x4x256xf32> to vector<2x256xf32>
    %43 = vector.shape_cast %42 : vector<2x256xf32> to vector<2x1x256xf32>
    %44 = math.log %43 : vector<2x1x256xf32>
    %45 = arith.addf %38, %44 : vector<2x1x256xf32>
    %46 = vector.shape_cast %45 : vector<2x1x256xf32> to vector<2x256xf32>
    %47 = arith.subf %35, %46 : vector<2x256xf32>
    %48 = arith.extui %0 : i1 to i32
    %c0_i32_20 = arith.constant 0 : i32
    %49 = arith.cmpi ne, %48, %c0_i32_20 : i32
    scf.if %49 {
      %c0_23 = arith.constant 0 : index
      %c0_24 = arith.constant 0 : index
      %c0_25 = arith.constant 0 : index
      %c0_26 = arith.constant 0 : index
      %54 = vector.load %arg7[%c0_23, %c0_24, %c0_25, %c0_26] : memref<1x2x2x256xf32, #tpu.memory_space<vmem>>, vector<1x1x2x256xf32>
      %55 = vector.shape_cast %54 : vector<1x1x2x256xf32> to vector<2x256xf32>
      %56 = vector.shape_cast %34 : vector<2x256xf32> to vector<1x1x2x256xf32>
      tpu.vector_store %arg7[%c0_23, %c0_24, %c0_25, %c0_26], %56 {strides = array<i32>} : memref<1x2x2x256xf32, #tpu.memory_space<vmem>>, vector<1x1x2x256xf32>,
      %c0_27 = arith.constant 0 : index
      %c1 = arith.constant 1 : index
      %c0_28 = arith.constant 0 : index
      %c0_29 = arith.constant 0 : index
      %57 = vector.load %arg7[%c0_27, %c1, %c0_28, %c0_29] : memref<1x2x2x256xf32, #tpu.memory_space<vmem>>, vector<1x1x2x256xf32>
      %58 = vector.shape_cast %57 : vector<1x1x2x256xf32> to vector<2x256xf32>
      %59 = vector.shape_cast %47 : vector<2x256xf32> to vector<1x1x2x256xf32>
      tpu.vector_store %arg7[%c0_27, %c1, %c0_28, %c0_29], %59 {strides = array<i32>} : memref<1x2x2x256xf32, #tpu.memory_space<vmem>>, vector<1x1x2x256xf32>,
    } else {
    }
    %50 = arith.extui %1 : i1 to i32
    %c0_i32_21 = arith.constant 0 : i32
    %51 = arith.cmpi ne, %50, %c0_i32_21 : i32
    scf.if %51 {
      %c0_23 = arith.constant 0 : index
      %c0_24 = arith.constant 0 : index
      %c0_25 = arith.constant 0 : index
      %c0_26 = arith.constant 0 : index
      %54 = vector.load %arg7[%c0_23, %c0_24, %c0_25, %c0_26] : memref<1x2x2x256xf32, #tpu.memory_space<vmem>>, vector<1x1x2x256xf32>
      %55 = vector.shape_cast %54 : vector<1x1x2x256xf32> to vector<2x256xf32>
      %56 = arith.addf %55, %34 : vector<2x256xf32>
      %c0_27 = arith.constant 0 : index
      %c0_28 = arith.constant 0 : index
      %c0_29 = arith.constant 0 : index
      %c0_30 = arith.constant 0 : index
      %57 = vector.load %arg7[%c0_27, %c0_28, %c0_29, %c0_30] : memref<1x2x2x256xf32, #tpu.memory_space<vmem>>, vector<1x1x2x256xf32>
      %58 = vector.shape_cast %57 : vector<1x1x2x256xf32> to vector<2x256xf32>
      %59 = vector.shape_cast %56 : vector<2x256xf32> to vector<1x1x2x256xf32>
      tpu.vector_store %arg7[%c0_27, %c0_28, %c0_29, %c0_30], %59 {strides = array<i32>} : memref<1x2x2x256xf32, #tpu.memory_space<vmem>>, vector<1x1x2x256xf32>,
      %c0_31 = arith.constant 0 : index
      %c1 = arith.constant 1 : index
      %c0_32 = arith.constant 0 : index
      %c0_33 = arith.constant 0 : index
      %60 = vector.load %arg7[%c0_31, %c1, %c0_32, %c0_33] : memref<1x2x2x256xf32, #tpu.memory_space<vmem>>, vector<1x1x2x256xf32>
      %61 = vector.shape_cast %60 : vector<1x1x2x256xf32> to vector<2x256xf32>
      %62 = arith.addf %61, %47 : vector<2x256xf32>
      %c0_34 = arith.constant 0 : index
      %c1_35 = arith.constant 1 : index
      %c0_36 = arith.constant 0 : index
      %c0_37 = arith.constant 0 : index
      %63 = vector.load %arg7[%c0_34, %c1_35, %c0_36, %c0_37] : memref<1x2x2x256xf32, #tpu.memory_space<vmem>>, vector<1x1x2x256xf32>
      %64 = vector.shape_cast %63 : vector<1x1x2x256xf32> to vector<2x256xf32>
      %65 = vector.shape_cast %62 : vector<2x256xf32> to vector<1x1x2x256xf32>
      tpu.vector_store %arg7[%c0_34, %c1_35, %c0_36, %c0_37], %65 {strides = array<i32>} : memref<1x2x2x256xf32, #tpu.memory_space<vmem>>, vector<1x1x2x256xf32>,
    } else {
    }
    %52 = arith.extui %2 : i1 to i32
    %c0_i32_22 = arith.constant 0 : i32
    %53 = arith.cmpi ne, %52, %c0_i32_22 : i32
    scf.if %53 {
      %c0_23 = arith.constant 0 : index
      %c0_24 = arith.constant 0 : index
      %c0_25 = arith.constant 0 : index
      %c0_26 = arith.constant 0 : index
      %54 = vector.load %arg7[%c0_23, %c0_24, %c0_25, %c0_26] : memref<1x2x2x256xf32, #tpu.memory_space<vmem>>, vector<1x1x2x128xf32>
      %55 = vector.shape_cast %54 : vector<1x1x2x128xf32> to vector<2x128xf32>
      %c0_27 = arith.constant 0 : index
      %c0_28 = arith.constant 0 : index
      %c0_29 = arith.constant 0 : index
      %c128 = arith.constant 128 : index
      %56 = vector.load %arg7[%c0_27, %c0_28, %c0_29, %c128] : memref<1x2x2x256xf32, #tpu.memory_space<vmem>>, vector<1x1x2x128xf32>
      %57 = vector.shape_cast %56 : vector<1x1x2x128xf32> to vector<2x128xf32>
      %58 = arith.addf %55, %57 : vector<2x128xf32>
      %c0_30 = arith.constant 0 : index
      %c0_31 = arith.constant 0 : index
      %c0_32 = arith.constant 0 : index
      %c0_33 = arith.constant 0 : index
      %59 = vector.load %arg6[%c0_30, %c0_31, %c0_32, %c0_33] : memref<1x2x2x128xf32, #tpu.memory_space<vmem>>, vector<1x1x2x128xf32>
      %60 = vector.shape_cast %59 : vector<1x1x2x128xf32> to vector<2x128xf32>
      %61 = vector.shape_cast %58 : vector<2x128xf32> to vector<1x1x2x128xf32>
      tpu.vector_store %arg6[%c0_30, %c0_31, %c0_32, %c0_33], %61 {strides = array<i32>} : memref<1x2x2x128xf32, #tpu.memory_space<vmem>>, vector<1x1x2x128xf32>,
      %c0_34 = arith.constant 0 : index
      %c1 = arith.constant 1 : index
      %c0_35 = arith.constant 0 : index
      %c0_36 = arith.constant 0 : index
      %62 = vector.load %arg7[%c0_34, %c1, %c0_35, %c0_36] : memref<1x2x2x256xf32, #tpu.memory_space<vmem>>, vector<1x1x2x128xf32>
      %63 = vector.shape_cast %62 : vector<1x1x2x128xf32> to vector<2x128xf32>
      %c0_37 = arith.constant 0 : index
      %c1_38 = arith.constant 1 : index
      %c0_39 = arith.constant 0 : index
      %c128_40 = arith.constant 128 : index
      %64 = vector.load %arg7[%c0_37, %c1_38, %c0_39, %c128_40] : memref<1x2x2x256xf32, #tpu.memory_space<vmem>>, vector<1x1x2x128xf32>
      %65 = vector.shape_cast %64 : vector<1x1x2x128xf32> to vector<2x128xf32>
      %66 = arith.addf %63, %65 : vector<2x128xf32>
      %c0_41 = arith.constant 0 : index
      %c1_42 = arith.constant 1 : index
      %c0_43 = arith.constant 0 : index
      %c0_44 = arith.constant 0 : index
      %67 = vector.load %arg6[%c0_41, %c1_42, %c0_43, %c0_44] : memref<1x2x2x128xf32, #tpu.memory_space<vmem>>, vector<1x1x2x128xf32>
      %68 = vector.shape_cast %67 : vector<1x1x2x128xf32> to vector<2x128xf32>
      %69 = vector.shape_cast %66 : vector<2x128xf32> to vector<1x1x2x128xf32>
      tpu.vector_store %arg6[%c0_41, %c1_42, %c0_43, %c0_44], %69 {strides = array<i32>} : memref<1x2x2x128xf32, #tpu.memory_space<vmem>>, vector<1x1x2x128xf32>,
    } else {
    }
    return
  }
  func.func @transform_0(%arg0: i32, %arg1: i32) -> (i32, i32, i32) {
    %c0_i32 = arith.constant 0 : i32
    %c0_i32_0 = arith.constant 0 : i32
    %c0_i32_1 = arith.constant 0 : i32
    return %c0_i32, %c0_i32_0, %arg1 : i32, i32, i32
  }
  func.func @transform_1(%arg0: i32, %arg1: i32) -> (i32, i32, i32) {
    %c0_i32 = arith.constant 0 : i32
    %c0_i32_0 = arith.constant 0 : i32
    %c0_i32_1 = arith.constant 0 : i32
    return %c0_i32, %c0_i32_0, %arg1 : i32, i32, i32
  }
  func.func @transform_2(%arg0: i32, %arg1: i32) -> (i32, i32, i32, i32) {
    %c0_i32 = arith.constant 0 : i32
    %c0_i32_0 = arith.constant 0 : i32
    %c0_i32_1 = arith.constant 0 : i32
    return %arg0, %c0_i32, %c0_i32_0, %arg1 : i32, i32, i32, i32
  }
  func.func @transform_3(%arg0: i32, %arg1: i32) -> (i32, i32) {
    %c0_i32 = arith.constant 0 : i32
    %c0_i32_0 = arith.constant 0 : i32
    return %c0_i32, %arg1 : i32, i32
  }
  func.func @transform_4(%arg0: i32, %arg1: i32) -> (i32, i32, i32, i32) {
    %c0_i32 = arith.constant 0 : i32
    %c0_i32_0 = arith.constant 0 : i32
    %c0_i32_1 = arith.constant 0 : i32
    %c0_i32_2 = arith.constant 0 : i32
    return %arg0, %c0_i32, %c0_i32_0, %c0_i32_1 : i32, i32, i32, i32
  }
}

</mosaic_0001>

<bundles_post_ra>
// kernel: ssn_loss_mc_integral.1
= control target key start
LH: loop header
LB: loop body
LE: loop exit
PB: predicated region body
PF: predicated region fallthrough
CT: control target
= control target key end

     0   :  { %s1021_s15 = smov 0   ;;  %s1023_s16 = smov 0   ;;  %s1228_s0 = inlined_call_operand.vmem [shape: bf16[2,4,256], index: 0, kind: input, shape index: {}]   ;;  %s1229_s1 = inlined_call_operand.vmem [shape: bf16[2,4,256], index: 1, kind: input, shape index: {}]   ;;  %s1230_s2 = inlined_call_operand.vmem [shape: bf16[2,2,4,256], index: 2, kind: input, shape index: {}]   ;;  %s1231_s3 = inlined_call_operand.vmem [shape: s32[2,256], index: 3, kind: input, shape index: {}]   ;;  %s1232_s4 = inlined_call_operand.vmem [shape: f32[2,2,2,128], index: 4, kind: output, shape index: {}]  }
   0x1   :  { %s1025_s17 = smov 0  }
   0x2 LB: > { %s26_s18 = sadd.s32 1, %s989_s16  ;;  %p899_p0 = scmp.ge.s32.totalorder %s993_s17, 1  ;;  %s993_s17 = sphi %s1025_s17, %s14_s17   ;;  %s989_s16 = sphi %s1023_s16, %s1234_s16   ;;  %s985_s15 = sphi %s1021_s15, %s1233_s15  }
   0x3   : > { %p28_p1 = scmp.ge.s32.totalorder %s26_s18, 2  ;;  %p214_p2 = scmp.lt.s32.totalorder %s993_s17, 3 }
   0x5   : > { %s1236_s18 = smov (%p28_p1, %s26_s18), 0  ;;  %p215_p3 = pnand %p899_p0, %p214_p2 }
   0x6   : > { %p272_p4 = scmp.lt.s32.totalorder (!%p215_p3), %s985_s15, 1 }
   0x7   : > { %218 = sbr.rel (%p215_p3) target bundleno = 123 (0x7b), region = 36 }
   0xc   : > { %s1238_s15 = smov (!%p272_p4, %s985_s15), 1  ;;  %v915_v0 = vld [vmem:[%s1229_s1] sm:$0xff]   ;;  %vm343_vm0 = vcmask 1043456   ;;  %v311_v17 = vlaneseq  ;;  %vm652_vm5 = vcmask 1041409   ;;  %vm654_vm6 = vcmask 1043459  }
   0xd   : > { %s908_s19 = sshll.u32 %s1238_s15, 3  ;;  %v916_v2 = vunpack.c.l.bf16 %v915_v0  ;;  %v917_v3 = vunpack.c.h.bf16 %v915_v0  ;;  %v911_v6 = vld [vmem:[%s1228_s0] sm:$0xff]   ;;  %vm656_vm7 = vcmask 1045509   ;;  %vm658_vm8 = vcmask 1047559   ;;  %s909_s29 = sshll.u32 %s1238_s15, 2 }
   0xe   : > { %s279_s22 = scalar_lea.vmem %s1230_s2, %s908_s19  ;;  %v1051_v7 = vunpack.c.l.bf16 %v911_v6  ;;  %v1053_v8 = vunpack.c.h.bf16 %v911_v6  ;;  %v904_v22 = vld.sshfl [vmem:[%s1231_s3] sm:$0x33 pattern:$0x75316420]  ;;  %v1080_v27 = vshrl.u32 %v311_v17, 7  ;;  %s291_s6 = scalar_lea.vmem %s1232_s4, %s909_s29 }
   0xf   : > { %v919_v1 = vld [vmem:[%s279_s22] sm:$0xff]   ;;  %v310_v34 = vcombine.high %v904_v22, %v904_v22 }
  0x10   : > { %v920_v4 = vunpack.c.l.bf16 %v919_v1  ;;  %v921_v5 = vunpack.c.h.bf16 %v919_v1  ;;  %v315_v39 = vsub.s32 0, %v1080_v27  ;;  %v335_v40 = vcombine.high %v1051_v7, %v1051_v7 }
  0x11   : > { %v319_v60 = vsub.s32 1, %v1080_v27 }
  0x12   : > { %v1055_v9 = vmul.f32 %v920_v4, %v916_v2  ;;  %v1057_v10 = vmul.f32 %v921_v5, %v917_v3  ;;  %v316_v59 = vrot.slane %v904_v22, %v315_v39  ;;  %v324_v4 = vrot.slane %v310_v34, %v315_v39 }
  0x13   : > { %v320_v3 = vrot.slane %v904_v22, %v319_v60  ;;  %v328_v17 = vrot.slane %v310_v34, %v319_v60 }
  0x14   : > { %v1061_v11 = vadd.f32 %v1051_v7, %v1055_v9  ;;  %v1065_v12 = vadd.f32 %v1053_v8, %v1057_v10  ;;  %v1084_v28 = vsub.f32 %v1051_v7, %v1055_v9  ;;  %v1088_v29 = vsub.f32 %v1053_v8, %v1057_v10 }
  0x15   : > { %vm329_vm1 = vcmp.eq.s32.totalorder %v1080_v27, %v316_v59  ;;  %vm331_vm2 = vcmp.eq.s32.totalorder %v1080_v27, %v324_v4  ;;  %vm330_vm3 = vcmp.eq.s32.totalorder %v1080_v27, %v320_v3  ;;  %vm332_vm4 = vcmp.eq.s32.totalorder %v1080_v27, %v328_v17 }
  0x16   : > { %v424_v13 = vcombine.high %v1061_v11, %v1061_v11  ;;  %v425_v14 = vcombine.high %v1065_v12, %v1065_v12  ;;  %v428_v15 = vsel %vm343_vm0, %v1061_v11, -inf  ;;  %v442_v16 = vsel %vm343_vm0, %v1065_v12, -inf }
  0x17   : > { %v429_v18 = vrot.slane %v428_v15, 4  ;;  %v443_v20 = vrot.slane %v442_v16, 4  ;;  %v528_v41 = vcombine.high %v1084_v28, %v1084_v28  ;;  %v529_v42 = vcombine.high %v1088_v29, %v1088_v29 }
  0x18   : > { %v435_v19 = vsel %vm343_vm0, %v424_v13, -inf  ;;  %v449_v21 = vsel %vm343_vm0, %v425_v14, -inf  ;;  %v532_v47 = vsel %vm343_vm0, %v1084_v28, -inf  ;;  %v546_v49 = vsel %vm343_vm0, %v1088_v29, -inf }
  0x19   : > { %v430_v23 = vmax.f32 %v428_v15, %v429_v18  ;;  %v436_v24 = vrot.slane %v435_v19, 4  ;;  %v444_v25 = vmax.f32 %v442_v16, %v443_v20  ;;  %v450_v26 = vrot.slane %v449_v21, 4 }
  0x1a   : > { %v539_v48 = vsel %vm343_vm0, %v528_v41, -inf  ;;  %v553_v50 = vsel %vm343_vm0, %v529_v42, -inf  ;;  %v533_v55 = vrot.slane %v532_v47, 4  ;;  %v547_v57 = vrot.slane %v546_v49, 4 }
  0x1b   : > { %v431_v30 = vrot.slane %v430_v23, 2  ;;  %v437_v31 = vmax.f32 %v435_v19, %v436_v24  ;;  %v445_v32 = vrot.slane %v444_v25, 2  ;;  %v451_v33 = vmax.f32 %v449_v21, %v450_v26 }
  0x1c   : > { %v540_v56 = vrot.slane %v539_v48, 4  ;;  %v554_v58 = vrot.slane %v553_v50, 4  ;;  %v534_v63 = vmax.f32 %v532_v47, %v533_v55  ;;  %v548_v1 = vmax.f32 %v546_v49, %v547_v57 }
  0x1d   : > { %v432_v35 = vmax.f32 %v430_v23, %v431_v30  ;;  %v438_v36 = vrot.slane %v437_v31, 2  ;;  %v446_v37 = vmax.f32 %v444_v25, %v445_v32  ;;  %v452_v38 = vrot.slane %v451_v33, 2 }
  0x1e   : > { %v541_v0 = vmax.f32 %v539_v48, %v540_v56  ;;  %v555_v2 = vmax.f32 %v553_v50, %v554_v58  ;;  %v535_v13 = vrot.slane %v534_v63, 2  ;;  %v549_v15 = vrot.slane %v548_v1, 2 }
  0x1f   : > { %v433_v43 = vrot.slane %v432_v35, 1  ;;  %v439_v44 = vmax.f32 %v437_v31, %v438_v36  ;;  %v447_v45 = vrot.slane %v446_v37, 1  ;;  %v453_v46 = vmax.f32 %v451_v33, %v452_v38 }
  0x20   : > { %v542_v14 = vrot.slane %v541_v0, 2  ;;  %v556_v16 = vrot.slane %v555_v2, 2  ;;  %v536_v20 = vmax.f32 %v534_v63, %v535_v13  ;;  %v550_v22 = vmax.f32 %v548_v1, %v549_v15 }
  0x21   : > { %v1103_v51 = vmax.f32 %v432_v35, %v433_v43  ;;  %v440_v52 = vrot.slane %v439_v44, 1  ;;  %v1105_v53 = vmax.f32 %v446_v37, %v447_v45  ;;  %v454_v54 = vrot.slane %v453_v46, 1 }
  0x22   : > { %v543_v21 = vmax.f32 %v541_v0, %v542_v14  ;;  %v557_v23 = vmax.f32 %v555_v2, %v556_v16  ;;  %v336_v24 = vcombine.high %v1053_v8, %v1053_v8  ;;  %v537_v30 = vrot.slane %v536_v20, 1 }
  0x23   : > { %v1108_v61 = vmax.f32 %v439_v44, %v440_v52  ;;  %v1110_v62 = vmax.f32 %v453_v46, %v454_v54  ;;  %v551_v32 = vrot.slane %v550_v22, 1  ;;  %v341_v36 = vsel %vm331_vm2, %v1053_v8, 0.0 }
  0x24   : > { %v544_v31 = vrot.slane %v543_v21, 1  ;;  %v558_v33 = vrot.slane %v557_v23, 1  ;;  %v340_v38 = vsel %vm330_vm3, %v335_v40, 0.0  ;;  %v380_v42 = vcombine.high %v1055_v9, %v1055_v9 }
  0x25   : > { %v460_v5 = vcombine.low %v1103_v51, %v1108_v61  ;;  %v461_v6 = vcombine.low %v1105_v53, %v1110_v62  ;;  %v1131_v35 = vmax.f32 %v550_v22, %v551_v32  ;;  %v381_v43 = vcombine.high %v1057_v10, %v1057_v10 }
  0x26   : > { %v1129_v34 = vmax.f32 %v543_v21, %v544_v31  ;;  %v1136_v37 = vmax.f32 %v557_v23, %v558_v33  ;;  %v358_v44 = vsel %vm343_vm0, %v341_v36, 0.0  ;;  %v351_v45 = vsel %vm343_vm0, %v340_v38, 0.0 }
  0x27   : > { %v464_v18 = vsub.f32 %v1061_v11, %v460_v5  ;;  %v465_v19 = vsub.f32 %v1065_v12, %v461_v6  ;;  %v339_v11 = vsel %vm329_vm1, %v1051_v7, 0.0  ;;  %v1127_v12 = vmax.f32 %v536_v20, %v537_v30 }
  0x28   : > { %v342_v7 = vsel %vm332_vm4, %v336_v24, 0.0  ;;  %v344_v41 = vsel %vm343_vm0, %v339_v11, 0.0  ;;  %v565_v8 = vcombine.low %v1131_v35, %v1136_v37  ;;  %v384_v47 = vsel %vm329_vm1, %v1055_v9, 0.0 }
  0x29   : > { %v466_v25 = vmul.f32 1.442695, %v464_v18  ;;  %v468_v26 = vmul.f32 1.442695, %v465_v19  ;;  %v564_v39 = vcombine.low %v1127_v12, %v1129_v34  ;;  %v365_v46 = vsel %vm343_vm0, %v342_v7, 0.0 }
  0x2a   : > { %v569_v48 = vsub.f32 %v1088_v29, %v565_v8  ;;  %v345_v49 = vrot.slane %v344_v41, 4  ;;  %v386_v50 = vsel %vm331_vm2, %v1057_v10, 0.0  ;;  %v359_v54 = vrot.slane %v358_v44, 4 }
  0x2b   : > { %947 = vpow2.f32 %v466_v25  ;;  %v568_v40 = vsub.f32 %v1084_v28, %v564_v39  ;;  %v385_v28 = vsel %vm330_vm3, %v380_v42, 0.0  ;;  %v387_v55 = vsel %vm332_vm4, %v381_v43, 0.0 }
  0x2c   : > { %949 = vpow2.f32 %v468_v26  ;;  %v572_v56 = vmul.f32 1.442695, %v569_v48  ;;  %v352_v57 = vrot.slane %v351_v45, 4  ;;  %v366_v58 = vrot.slane %v365_v46, 4 }
  0x2d   : > { %v570_v52 = vmul.f32 1.442695, %v568_v40  ;;  %v388_v9 = vsel %vm343_vm0, %v384_v47, 0.0  ;;  %v402_v29 = vsel %vm343_vm0, %v386_v50, 0.0  ;;  %v346_v59 = vadd.f32 %v345_v49, %v344_v41 }
  0x2e   : > { %v395_v10 = vsel %vm343_vm0, %v385_v28, 0.0  ;;  %v409_v60 = vsel %vm343_vm0, %v387_v55, 0.0  ;;  %v360_v63 = vadd.f32 %v359_v54, %v358_v44  ;;  %v389_v0 = vrot.slane %v388_v9, 4 }
  0x2f   : > { %951 = vpow2.f32 %v570_v52  ;;  %v1170_v2 = vadd.f32 %v352_v57, %v351_v45  ;;  %v1172_v3 = vadd.f32 %v366_v58, %v365_v46  ;;  %v403_v4 = vrot.slane %v402_v29, 4 }
  0x30   : > { %953 = vpow2.f32 %v572_v56  ;;  %v396_v6 = vrot.slane %v395_v10, 4  ;;  %v410_v13 = vrot.slane %v409_v60, 4  ;;  %v347_v16 = vrot.slane %v346_v59, 2 }
  0x31   : > { %v361_v20 = vrot.slane %v360_v63, 2  ;;  %v390_v21 = vadd.f32 %v389_v0, %v388_v9  ;;  %v404_v24 = vadd.f32 %v403_v4, %v402_v29  ;;  %v354_v36 = vrot.slane %v1170_v2, 2 }
  0x32   : > { %v397_v31 = vadd.f32 %v396_v6, %v395_v10  ;;  %v411_v32 = vadd.f32 %v410_v13, %v409_v60  ;;  %v368_v38 = vrot.slane %v1172_v3, 2  ;;  %v1180_v41 = vadd.f32 %v347_v16, %v346_v59 }
  0x33   : > { %v1182_v42 = vadd.f32 %v361_v20, %v360_v63  ;;  %v391_v44 = vrot.slane %v390_v21, 2  ;;  %v405_v40 = vrot.slane %v404_v24, 2 }
  0x34   : > { %v398_v48 = vrot.slane %v397_v31, 2  ;;  %v412_v49 = vrot.slane %v411_v32, 2 }
  0x38   : > { %v948_v1 = vpop.eup %947 }
  0x39   : > { %v950_v5 = vpop.eup %949  ;;  %v472_v14 = vcombine.high %v948_v1, %v948_v1  ;;  %v476_v15 = vsel %vm343_vm0, %v948_v1, 0.0 }
  0x3a   : > { %v473_v17 = vcombine.high %v950_v5, %v950_v5  ;;  %v477_v18 = vrot.slane %v476_v15, 4  ;;  %v490_v19 = vsel %vm343_vm0, %v950_v5, 0.0 }
  0x3b   : > { %v483_v22 = vsel %vm343_vm0, %v472_v14, 0.0  ;;  %v491_v23 = vrot.slane %v490_v19, 4 }
  0x3c   : > { %v478_v25 = vadd.f32 %v477_v18, %v476_v15  ;;  %v484_v26 = vrot.slane %v483_v22, 4  ;;  %v497_v30 = vsel %vm343_vm0, %v473_v17, 0.0  ;;  %v952_v47 = vpop.eup %951 }
  0x3d   : > { %v492_v33 = vadd.f32 %v491_v23, %v490_v19  ;;  %v498_v11 = vrot.slane %v497_v30, 4  ;;  %v954_v54 = vpop.eup %953  ;;  %v576_v56 = vcombine.high %v952_v47, %v952_v47  ;;  %v580_v57 = vsel %vm343_vm0, %v952_v47, 0.0 }
  0x3e   : > { %v479_v7 = vrot.slane %v478_v25, 2  ;;  %v485_v39 = vadd.f32 %v484_v26, %v483_v22  ;;  %v577_v29 = vcombine.high %v954_v54, %v954_v54  ;;  %v581_v59 = vrot.slane %v580_v57, 4 }
  0x3f   : > { %v493_v43 = vrot.slane %v492_v33, 2  ;;  %v499_v8 = vadd.f32 %v498_v11, %v497_v30  ;;  %v587_v63 = vsel %vm343_vm0, %v576_v56, 0.0  ;;  %v594_v0 = vsel %vm343_vm0, %v954_v54, 0.0 }
  0x40   : > { %v480_v45 = vadd.f32 %v479_v7, %v478_v25  ;;  %v486_v46 = vrot.slane %v485_v39, 2  ;;  %v582_v5 = vadd.f32 %v581_v59, %v580_v57  ;;  %v588_v6 = vrot.slane %v587_v63, 4 }
  0x41   : > { %v494_v50 = vadd.f32 %v493_v43, %v492_v33  ;;  %v500_v52 = vrot.slane %v499_v8, 2  ;;  %v595_v14 = vrot.slane %v594_v0, 4  ;;  %v601_v15 = vsel %vm343_vm0, %v577_v29, 0.0 }
  0x42   : > { %v481_v28 = vrot.slane %v480_v45, 1  ;;  %v487_v55 = vadd.f32 %v486_v46, %v485_v39  ;;  %v583_v17 = vrot.slane %v582_v5, 2  ;;  %v589_v18 = vadd.f32 %v588_v6, %v587_v63 }
  0x43   : > { %v495_v58 = vrot.slane %v494_v50, 1  ;;  %v501_v9 = vadd.f32 %v500_v52, %v499_v8  ;;  %v392_v19 = vadd.f32 %v391_v44, %v390_v21  ;;  %v596_v20 = vadd.f32 %v595_v14, %v594_v0 }
  0x44   : > { %v482_v10 = vadd.f32 %v481_v28, %v480_v45  ;;  %v488_v60 = vrot.slane %v487_v55, 1  ;;  %v602_v22 = vrot.slane %v601_v15, 4  ;;  %v406_v23 = vadd.f32 %v405_v40, %v404_v24 }
  0x45   : > { %v496_v1 = vadd.f32 %v495_v58, %v494_v50  ;;  %v502_v4 = vrot.slane %v501_v9, 1  ;;  %v584_v25 = vadd.f32 %v583_v17, %v582_v5  ;;  %v590_v26 = vrot.slane %v589_v18, 2 }
  0x46   : > { %v489_v13 = vadd.f32 %v488_v60, %v487_v55  ;;  %955 = vlog2.f32 %v482_v10  ;;  %v355_v30 = vadd.f32 %v354_v36, %v1170_v2  ;;  %v399_v33 = vadd.f32 %v398_v48, %v397_v31 }
  0x47   : > { %v503_v16 = vadd.f32 %v502_v4, %v501_v9  ;;  %957 = vlog2.f32 %v496_v1  ;;  %v597_v11 = vrot.slane %v596_v20, 2  ;;  %v603_v7 = vadd.f32 %v602_v22, %v601_v15 }
  0x48   : > { %959 = vlog2.f32 %v489_v13  ;;  %v369_v39 = vadd.f32 %v368_v38, %v1172_v3  ;;  %v413_v43 = vadd.f32 %v412_v49, %v411_v32  ;;  %v585_v8 = vrot.slane %v584_v25, 1 }
  0x49   : > { %961 = vlog2.f32 %v503_v16  ;;  %v591_v45 = vadd.f32 %v590_v26, %v589_v18  ;;  %v349_v46 = vrot.slane %v1180_v41, 1  ;;  %v393_v21 = vrot.slane %v392_v19, 1 }
  0x4a   : > { %v598_v44 = vadd.f32 %v597_v11, %v596_v20  ;;  %v604_v47 = vrot.slane %v603_v7, 2  ;;  %v363_v24 = vrot.slane %v1182_v42, 1  ;;  %v407_v40 = vrot.slane %v406_v23, 1 }
  0x4b   : > { %v586_v50 = vadd.f32 %v585_v8, %v584_v25  ;;  %v592_v52 = vrot.slane %v591_v45, 1  ;;  %v356_v54 = vrot.slane %v355_v30, 1  ;;  %v400_v2 = vrot.slane %v399_v33, 1 }
  0x4c   : > { %v599_v31 = vrot.slane %v598_v44, 1  ;;  %v605_v36 = vadd.f32 %v604_v47, %v603_v7  ;;  %v370_v48 = vrot.slane %v369_v39, 1  ;;  %v414_v28 = vrot.slane %v413_v43, 1 }
  0x4d   : > { %v593_v3 = vadd.f32 %v592_v52, %v591_v45  ;;  %963 = vlog2.f32 %v586_v50  ;;  %v350_v32 = vadd.f32 %v349_v46, %v1180_v41  ;;  %v394_v38 = vadd.f32 %v393_v21, %v392_v19 }
  0x4e   : > { %v600_v49 = vadd.f32 %v599_v31, %v598_v44  ;;  %v606_v55 = vrot.slane %v605_v36, 1  ;;  %v1194_v56 = vadd.f32 %v363_v24, %v1182_v42  ;;  %v408_v57 = vadd.f32 %v407_v40, %v406_v23 }
  0x4f   : > { %965 = vlog2.f32 %v593_v3  ;;  %v357_v58 = vadd.f32 %v356_v54, %v355_v30  ;;  %v401_v9 = vadd.f32 %v400_v2, %v399_v33  ;;  %v371_v10 = vadd.f32 %v370_v48, %v369_v39 }
  0x50   : > { %v607_v29 = vadd.f32 %v606_v55, %v605_v36  ;;  %967 = vlog2.f32 %v600_v49  ;;  %v415_v60 = vadd.f32 %v414_v28, %v413_v43  ;;  %v995_v63 = vmov 1983009808  }
  0x51   : > { %v633_v0 = vunpack.c.l.s4 %v995_v63  ;;  %v416_v4 = vadd.f32 %v394_v38, %v350_v32  ;;  %v418_v6 = vadd.f32 %v408_v57, %v1194_v56  ;;  %v417_v14 = vadd.f32 %v401_v9, %v357_v58 }
  0x52   : > { %969 = vlog2.f32 %v607_v29  ;;  %v419_v17 = vadd.f32 %v415_v60, %v371_v10  ;;  %v520_v45 = vsub.f32 %v350_v32, %v394_v38  ;;  %v521_v46 = vsub.f32 %v357_v58, %v401_v9 }
  0x53   : > { %v956_v59 = vpop.eup %955  ;;  %v634_v20 = vunpack.c.0.s8 %v633_v0  ;;  %v523_v52 = vsub.f32 %v371_v10, %v415_v60 }
  0x54   : > { %v958_v1 = vpop.eup %957  ;;  %v505_v41 = vmul.f32 0.6931472, %v956_v59 }
  0x55   : > { %v960_v5 = vpop.eup %959  ;;  %v509_v42 = vmul.f32 0.6931472, %v958_v1  ;;  %v637_v11 = vsub.s32 %v634_v20, %v1080_v27 }
  0x56   : > { %v962_v13 = vpop.eup %961  ;;  %v507_v15 = vmul.f32 0.6931472, %v960_v5  ;;  %v512_v16 = vadd.f32 %v505_v41, %v1103_v51 }
  0x57   : > { %v511_v18 = vmul.f32 0.6931472, %v962_v13  ;;  %v514_v19 = vadd.f32 %v509_v42, %v1105_v53 }
  0x58   : > { %v513_v22 = vadd.f32 %v507_v15, %v1108_v61  ;;  %v516_v23 = vsub.f32 %v416_v4, %v512_v16 }
  0x59   : > { %v515_v25 = vadd.f32 %v511_v18, %v1110_v62  ;;  %v518_v26 = vsub.f32 %v418_v6, %v514_v19  ;;  %v522_v62 = vsub.f32 %v1194_v56, %v408_v57 }
  0x5a   : > { %v517_v30 = vsub.f32 %v417_v14, %v513_v22  ;;  %v964_v7 = vpop.eup %963 }
  0x5b   : > { %v519_v33 = vsub.f32 %v419_v17, %v515_v25  ;;  %v609_v43 = vmul.f32 0.6931472, %v964_v7 }
  0x5c   : > { %v631_v39 = vcombine.low %v516_v23, %v517_v30  ;;  %v966_v51 = vpop.eup %965 }
  0x5d   : > { %v639_v8 = vcombine.low %v518_v26, %v519_v33  ;;  %v968_v21 = vpop.eup %967  ;;  %v611_v53 = vmul.f32 0.6931472, %v966_v51  ;;  %v616_v44 = vadd.f32 %v609_v43, %v1127_v12 }
  0x5e   : > { %v638_v61 = vrot.slane %v631_v39, %v637_v11  ;;  %v613_v24 = vmul.f32 0.6931472, %v968_v21 }
  0x5f   : > { %v646_v47 = vrot.slane %v639_v8, %v637_v11  ;;  %v970_v40 = vpop.eup %969  ;;  %v617_v27 = vadd.f32 %v611_v53, %v1129_v34  ;;  %v620_v31 = vsub.f32 %v520_v45, %v616_v44 }
  0x60   : > { %v615_v54 = vmul.f32 0.6931472, %v970_v40  ;;  %v618_v2 = vadd.f32 %v613_v24, %v1131_v35 }
  0x61   : > { %v651_v50 = vrot.slane %v646_v47, 7  ;;  %v621_v36 = vsub.f32 %v521_v46, %v617_v27 }
  0x62   : > { %v619_v48 = vadd.f32 %v615_v54, %v1136_v37  ;;  %v622_v28 = vsub.f32 %v522_v62, %v618_v2 }
  0x63   : > { %v653_v12 = vsel %vm652_vm5, %v651_v50, %v638_v61  ;;  %v666_v49 = vcombine.low %v620_v31, %v621_v36 }
  0x64   : > { %v655_v3 = vsel %vm654_vm6, %v651_v50, %v653_v12  ;;  %v623_v32 = vsub.f32 %v523_v52, %v619_v48 }
  0x65   : > { %v657_v34 = vsel %vm656_vm7, %v651_v50, %v655_v3  ;;  %v673_v35 = vrot.slane %v666_v49, %v637_v11 }
  0x66   : > { %v659_v38 = vsel %vm658_vm8, %v651_v50, %v657_v34  ;;  %v674_v55 = vcombine.low %v622_v28, %v623_v32 }
  0x67   : > { %661 = vst [vmem:[#allocation2] sm:$0xf] %v659_v38 }
  0x68   : > { %v681_v56 = vrot.slane %v674_v55, %v637_v11 }
  0x6a   : > { %v684_v57 = vrot.slane %v681_v56, 7 }
  0x6c   : > { %v685_v37 = vsel %vm652_vm5, %v684_v57, %v673_v35 }
  0x6d   : > { %v686_v29 = vsel %vm654_vm6, %v684_v57, %v685_v37 }
  0x6e   : > { %v767_v58 = vld [vmem:[#allocation2] sm:$0x3]  ;;  %v768_v9 = vld [vmem:[#allocation2 + $0x2] sm:$0x3]  ;;  %v687_v10 = vsel %vm656_vm7, %v684_v57, %v686_v29 }
  0x6f   : > { %v769_v59 = vadd.f32 %v768_v9, %v767_v58  ;;  %v688_v60 = vsel %vm658_vm8, %v684_v57, %v687_v10 }
  0x70   : > { %691 = vst [vmem:[#allocation2 + $0x4] sm:$0xf] %v688_v60 }
  0x71   : > { %770 = vst [vmem:[%s291_s6] sm:$0x3] %v769_v59 }
  0x77   : > { %v772_v63 = vld [vmem:[#allocation2 + $0x4] sm:$0x3]  ;;  %v773_v0 = vld [vmem:[#allocation2 + $0x6] sm:$0x3] }
  0x78   : > { %v774_v1 = vadd.f32 %v773_v0, %v772_v63 }
  0x7a   : > { %905 = vst [vmem:[%s291_s6 + $0x2] sm:$0x3] %v774_v1 }
  0x7b PF: > { %s14_s17 = sadd.s32 1, %s993_s17   ;;  %s1233_s15 = smov %s989_s16 }
  0x7c   : > { %p11_p5 = scmp.ge.s32.totalorder %s14_s17, 4   ;;  %s1234_s16 = smov %s1236_s18 }
  0x7e   :  { %13 = sbr.rel (!%p11_p5) target bundleno = 2 (0x2), region = 91 }

</bundles_post_ra>
